<compile_context>
chip_gen: v7x
topology: tpu7x:2x2x1
jax: 0.10.0
libtpu: 0.0.40
codegen_flags: <defaults>
</compile_context>

<pallas_src>
import numpy as np
import jax
import jax.numpy as jnp
from jax.experimental import pallas as pl
from jax.experimental.pallas import tpu as pltpu


# --------------------------- trace-time constants ---------------------------

def _round_up(n, m):
    return ((n + m - 1) // m) * m


def _conv1_patch_indices(H, W, Hp, Wp, K1):
    """Flat-spatial gather indices for the circular 5x5 conv1 patches.

    Rows ordered (pool-corner d, pooled-row i); columns (pooled-col j, ky, kx)
    padded from Wp*25 up to K1.  Padded columns point at pixel 0 and meet
    all-zero rows of the repacked conv1 weight, so they contribute nothing.
    """
    idx = np.zeros((4 * Hp, K1), np.int32)
    for d in range(4):
        dh, dw = d // 2, d % 2
        for i in range(Hp):
            for j in range(Wp):
                for ky in range(5):
                    for kx in range(5):
                        y = (2 * i + dh + ky - 2) % H
                        xx = (2 * j + dw + kx - 2) % W
                        idx[d * Hp + i, j * 25 + ky * 5 + kx] = y * W + xx
    return idx


def _row_shift_mats(B, Hp):
    """Fallback-only: Pi[di] @ p yields p[(b,(i+di)%Hp)] at row (b,i), di=-1,+1.

    Used only when Hp is not a multiple of the f32 sublane tile (8), where the
    in-kernel pltpu.roll path does not apply.  O((B*Hp)^2), acceptable for the
    small odd shapes that would take this path.
    """
    R = B * Hp
    out = np.zeros((2 * R, R), np.float32)
    for k, di in enumerate((-1, 1)):
        for b in range(B):
            for i in range(Hp):
                out[k * R + b * Hp + i, b * Hp + (i + di) % Hp] = 1.0
    return out


# --------------------------- one-time weight repack --------------------------

def prepare_params(params, attr_num, shuffle_time, matmul_dtype=jnp.float32):
    """Host-side, one-time repack of the PyTorch-layout weights.

    Circular width padding, pooling-corner handling and the
    'b c h w -> b (c h w)' rearrange are folded into these matrices so the
    kernel is 3 matmuls + elementwise max/relu + 2 sublane rolls + sigmoid.
    Set matmul_dtype=jnp.bfloat16 on v6e/v7x for MXU-native operands.
    """
    (w1, b1, w2, b2, wf1, bf1, wf2, bf2) = params
    Hp, Wp = attr_num // 2, shuffle_time // 2
    K1 = _round_up(Wp * 25, 128)          # conv1 contraction dim, lane-aligned
    f32 = jnp.float32
    eye_w = jnp.eye(Wp, dtype=f32)

    # conv1: block-diagonal over the Wp lane groups (lanes = (j, c_out)),
    # rows Wp*25..K1-1 are zero to match the padded patch columns.
    w1m = w1.reshape(8, 25).T.astype(f32)                        # (25, 8)
    w1big = jnp.kron(eye_w, w1m)                                 # (Wp*25, Wp*8)
    w1big = jnp.pad(w1big, ((0, K1 - Wp * 25), (0, 0)))
    b1big = jnp.tile(b1.astype(f32), Wp).reshape(1, Wp * 8)

    # conv2: (3*Wp*8, Wp*16); row-block kh pairs with the height-shifted
    # activation chunk [p(i-1) | p | p(i+1)]; circular width (kw) shifts are
    # folded in via lane-group permutations.
    def lane_shift(dj, g):
        P = np.zeros((Wp * g, Wp * g), np.float32)
        for j in range(Wp):
            for c in range(g):
                P[((j + dj) % Wp) * g + c, j * g + c] = 1.0
        return jnp.asarray(P)

    chunks = []
    for kh in range(3):
        acc = jnp.zeros((Wp * 8, Wp * 16), f32)
        for kw in range(3):
            w2t = w2[:, :, kh, kw].T.astype(f32)                 # (8 ci, 16 co)
            acc = acc + lane_shift(kw - 1, 8) @ jnp.kron(eye_w, w2t)
        chunks.append(acc)
    w2rows = jnp.concatenate(chunks, axis=0)                     # (3*Wp*8, Wp*16)
    b2big = jnp.tile(b2.astype(f32), Wp).reshape(1, Wp * 16)

    # fc1: fold the 'b c h w -> b (c h w)' rearrange into the weight by
    # permuting its columns into the kernel's (i, (j, c_out)) feature order,
    # so the head is one GEMM on c2 reshaped to (B, Hp*Wp*16).
    nh = wf1.shape[0]
    wh1 = (wf1.astype(f32).reshape(nh, 16, Hp, Wp)
           .transpose(2, 3, 1, 0).reshape(Hp * Wp * 16, nh))
    bf1row = bf1.astype(f32).reshape(1, nh)
    wf2row = wf2.astype(f32).reshape(1, nh)
    bf2row = bf2.astype(f32).reshape(1, 1)

    md = matmul_dtype
    return (w1big.astype(md), b1big, w2rows.astype(md), b2big,
            wh1.astype(md), bf1row, wf2row, bf2row)


# ------------------------------ fused Pallas kernel --------------------------

def _make_kernel(bt, Hp, Wp, use_roll):
    C1, C2 = Wp * 8, Wp * 16
    Rt = bt * Hp
    f32 = jnp.float32

    def mm(a, b):   # MXU matmul: operands in the weight dtype, f32 accumulation
        return jnp.dot(a.astype(b.dtype), b, preferred_element_type=f32)

    def body(patch_ref, w1_ref, b1_ref, w2_ref, b2_ref,
             wh1_ref, bf1_ref, wf2_ref, bf2_ref, o_ref, pis_ref):
        # conv1 over all 4 pooling corners in ONE matmul, then the 2x2
        # max-pool as an elementwise max of the four corner slices.
        acc = mm(patch_ref[...], w1_ref[...])                    # (4*Rt, C1)
        a4 = acc.reshape(bt, 4, Hp, C1)
        pooled = jnp.maximum(jnp.maximum(a4[:, 0], a4[:, 1]),
                             jnp.maximum(a4[:, 2], a4[:, 3]))    # (bt, Hp, C1)
        p = jnp.maximum(pooled.reshape(Rt, C1) + b1_ref[...], 0.0)

        # conv2: circular height shifts via sublane rolls (XLU, no O(B^2)
        # constants); width shifts pre-folded into w2; ONE K=3*C1 matmul over
        # the lane-concatenated activations.
        if use_roll:
            p3 = p.reshape(bt, Hp, C1)
            pm = pltpu.roll(p3, 1, 1).reshape(Rt, C1)            # row i <- i-1
            pp = pltpu.roll(p3, Hp - 1, 1).reshape(Rt, C1)       # row i <- i+1
        else:   # Hp not a multiple of the f32 sublane tile: permutation matmul
            pm = jnp.dot(pis_ref[pl.ds(0, Rt), :], p,
                         preferred_element_type=f32)
            pp = jnp.dot(pis_ref[pl.ds(Rt, Rt), :], p,
                         preferred_element_type=f32)
        pcat = jnp.concatenate([pm, p, pp], axis=1)              # (Rt, 3*C1)
        c2 = jnp.maximum(mm(pcat, w2_ref[...]) + b2_ref[...], 0.0)  # (Rt, C2)

        # head: ONE fc1 GEMM on the flattened features (fc1 columns are
        # pre-permuted, so the row-major reshape is already the right order),
        # then relu -> fc2 (VPU mul + lane reduce) -> stable exact sigmoid.
        # TODO(synk): nn.Dropout(0.5) layers are identity at inference;
        # training-mode stochastic masking is not implemented.
        feats = c2.reshape(bt, Hp, C2).reshape(bt, Hp * C2)
        h = jnp.maximum(mm(feats, wh1_ref[...]) + bf1_ref[...], 0.0)  # (bt, nh)
        z = jnp.sum(h * wf2_ref[...], axis=-1, keepdims=True) + bf2_ref[...]
        t = jnp.exp(-jnp.abs(z))
        o_ref[...] = jnp.where(z >= 0.0, 1.0, t) / (1.0 + t)

    if use_roll:
        def kernel(patch_ref, w1_ref, b1_ref, w2_ref, b2_ref,
                   wh1_ref, bf1_ref, wf2_ref, bf2_ref, o_ref):
            body(patch_ref, w1_ref, b1_ref, w2_ref, b2_ref,
                 wh1_ref, bf1_ref, wf2_ref, bf2_ref, o_ref, None)
    else:
        def kernel(patch_ref, pis_ref, w1_ref, b1_ref, w2_ref, b2_ref,
                   wh1_ref, bf1_ref, wf2_ref, bf2_ref, o_ref):
            body(patch_ref, w1_ref, b1_ref, w2_ref, b2_ref,
                 wh1_ref, bf1_ref, wf2_ref, bf2_ref, o_ref, pis_ref)
    return kernel


def aqpnet_forward(x, prepped):
    (w1big, b1big, w2rows, b2big, wh1, bf1row, wf2row, bf2row) = prepped
    B, _, H, W = x.shape
    Hp, Wp = H // 2, W // 2
    K1 = w1big.shape[0]
    use_roll = (Hp % 8 == 0)       # sublane-aligned height -> in-kernel roll

    # Batch grid axis ("parallel"): the two v7x TensorCores split the batch
    # when B is large; a single grid point otherwise (serial on v5e/v6e).
    bt = 8 if (use_roll and B > 8 and B % 8 == 0) else B
    nb = B // bt

    # Single XLA gather: conv1 im2col patches for all four pooling corners,
    # rows ordered (b, corner, i) -> no XLA-side transpose needed.
    idx = jnp.asarray(_conv1_patch_indices(H, W, Hp, Wp, K1))    # (4*Hp, K1)
    patches = jnp.take(x.reshape(B, H * W), idx, axis=1)         # (B, 4*Hp, K1)
    patches = patches.reshape(B * 4 * Hp, K1)

    full = lambda a: pl.BlockSpec(a.shape, lambda n: (0, 0))
    args = [patches]
    in_specs = [pl.BlockSpec((bt * 4 * Hp, K1), lambda n: (n, 0))]
    if not use_roll:
        pis = jnp.asarray(_row_shift_mats(B, Hp))                # fallback only
        args.append(pis)
        in_specs.append(full(pis))
    weights = (w1big, b1big, w2rows, b2big, wh1, bf1row, wf2row, bf2row)
    args += list(weights)
    in_specs += [full(a) for a in weights]

    return pl.pallas_call(
        _make_kernel(bt, Hp, Wp, use_roll),
        out_shape=jax.ShapeDtypeStruct((B, 1), jnp.float32),
        grid=(nb,),
        in_specs=in_specs,
        out_specs=pl.BlockSpec((bt, 1), lambda n: (n, 0)),
        compiler_params=pltpu.CompilerParams(
            dimension_semantics=("parallel",)),
    )(*args)


# --------------------- pure-XLA reference (verification) ---------------------

def aqpnet_reference(x, params):
    (w1, b1, w2, b2, wf1, bf1, wf2, bf2) = params
    hi = jax.lax.Precision.HIGHEST
    dn = ("NCHW", "OIHW", "NCHW")
    pad = lambda v, p: jnp.pad(v, ((0, 0), (0, 0), (p, p), (p, p)), mode="wrap")
    y = jax.lax.conv_general_dilated(pad(x, 2), w1, (1, 1), "VALID",
                                     dimension_numbers=dn, precision=hi)
    y = jax.nn.relu(y + b1[None, :, None, None])
    y = jax.lax.reduce_window(y, -jnp.inf, jax.lax.max,
                              (1, 1, 2, 2), (1, 1, 2, 2), "VALID")
    y = jax.lax.conv_general_dilated(pad(y, 1), w2, (1, 1), "VALID",
                                     dimension_numbers=dn, precision=hi)
    y = jax.nn.relu(y + b2[None, :, None, None])
    y = y.reshape(x.shape[0], -1)
    y = jax.nn.relu(jnp.dot(y, wf1.T, precision=hi) + bf1)
    y = jnp.dot(y, wf2.T, precision=hi) + bf2
    return jax.nn.sigmoid(y)


def init_params(key, attr_num, shuffle_time):
    total_pad = 2                # first_level_pad(2) * second_level_pad(1)
    assert attr_num % total_pad == 0 and shuffle_time % total_pad == 0
    fc1_in = attr_num // total_pad * shuffle_time // total_pad * 16

    ks = jax.random.split(key, 8)

    def rnd(k, shape, fan_in):
        return (jax.random.normal(k, shape, jnp.float32) /
                np.sqrt(float(fan_in))).astype(jnp.float32)

    w1 = rnd(ks[0], (8, 1, 5, 5), 25)
    b1 = rnd(ks[1], (8,), 25)
    w2 = rnd(ks[2], (16, 8, 3, 3), 72)
    b2 = rnd(ks[3], (16,), 72)
    wf1 = rnd(ks[4], (128, fc1_in), fc1_in)
    bf1 = rnd(ks[5], (128,), fc1_in)
    wf2 = rnd(ks[6], (1, 128), 128)
    bf2 = rnd(ks[7], (1,), 128)
    return (w1, b1, w2, b2, wf1, bf1, wf2, bf2)


if __name__ == "__main__":
    # Input is (B, 1, attr_num, shuffle_time); one 2x2 pool yields the
    # (attr_num//2)*(shuffle_time//2)*16 features fc1 expects.
    attr_num, shuffle_time = 16, 16
    B = 2
    H, W = attr_num, shuffle_time

    key = jax.random.PRNGKey(0)
    kx, kp = jax.random.split(key)
    x = jax.random.normal(kx, (B, 1, H, W), jnp.float32)
    params = init_params(kp, attr_num, shuffle_time)
    prepped = prepare_params(params, attr_num, shuffle_time)   # one-time repack

    out = jax.jit(aqpnet_forward)(x, prepped)
    out = jax.block_until_ready(out)
    assert out.shape == (B, 1) and out.dtype == jnp.float32

    ref = jax.block_until_ready(aqpnet_reference(x, params))
    # Sigmoid is exact now (no approx reciprocal); the tolerance only covers
    # MXU f32 pass-splitting / accumulation-order differences.
    np.testing.assert_allclose(np.asarray(out), np.asarray(ref),
                               rtol=5e-4, atol=5e-4)
    print("KERNEL_OK")
</pallas_src>

<mosaic_0001>
module attributes {stable_mosaic.version = 11 : i64} {
  func.func @kernel(%arg0: i32, %arg1: memref<64x256xf32, #tpu.memory_space<vmem>>, %arg2: memref<256x64xf32, #tpu.memory_space<vmem>>, %arg3: memref<1x64xf32, #tpu.memory_space<vmem>>, %arg4: memref<192x128xf32, #tpu.memory_space<vmem>>, %arg5: memref<1x128xf32, #tpu.memory_space<vmem>>, %arg6: memref<1024x128xf32, #tpu.memory_space<vmem>>, %arg7: memref<1x128xf32, #tpu.memory_space<vmem>>, %arg8: memref<1x128xf32, #tpu.memory_space<vmem>>, %arg9: memref<1x1xf32, #tpu.memory_space<vmem>>, %arg10: memref<2x1xf32, #tpu.memory_space<vmem>>) attributes {dimension_semantics = [#tpu.dimension_semantics<parallel>], iteration_bounds = array<i64: 1>, scalar_prefetch = 0 : i64, scratch_operands = 0 : i64, tpu.core_type = #tpu.core_type<tc>, window_params = [{transform_indices = @transform_0, window_bounds = array<i64: 64, 256>}, {pipeline_mode = #tpu.pipeline_mode<synchronous>, transform_indices = @transform_1, window_bounds = array<i64: 256, 64>}, {pipeline_mode = #tpu.pipeline_mode<synchronous>, transform_indices = @transform_2, window_bounds = array<i64: 1, 64>}, {pipeline_mode = #tpu.pipeline_mode<synchronous>, transform_indices = @transform_3, window_bounds = array<i64: 192, 128>}, {pipeline_mode = #tpu.pipeline_mode<synchronous>, transform_indices = @transform_4, window_bounds = array<i64: 1, 128>}, {pipeline_mode = #tpu.pipeline_mode<synchronous>, transform_indices = @transform_5, window_bounds = array<i64: 1024, 128>}, {pipeline_mode = #tpu.pipeline_mode<synchronous>, transform_indices = @transform_6, window_bounds = array<i64: 1, 128>}, {pipeline_mode = #tpu.pipeline_mode<synchronous>, transform_indices = @transform_7, window_bounds = array<i64: 1, 128>}, {pipeline_mode = #tpu.pipeline_mode<synchronous>, transform_indices = @transform_8, window_bounds = array<i64: 1, 1>}, {transform_indices = @transform_9, window_bounds = array<i64: 2, 1>}]} {
    %c0 = arith.constant 0 : index
    %c0_0 = arith.constant 0 : index
    %0 = vector.load %arg1[%c0, %c0_0] : memref<64x256xf32, #tpu.memory_space<vmem>>, vector<64x256xf32>
    %c0_1 = arith.constant 0 : index
    %c0_2 = arith.constant 0 : index
    %1 = vector.load %arg2[%c0_1, %c0_2] : memref<256x64xf32, #tpu.memory_space<vmem>>, vector<256x64xf32>
    %cst = arith.constant dense<0.000000e+00> : vector<64x64xf32>
    %2 = tpu.matmul %0, %1, %cst {dimension_numbers = #tpu.dot_dimension_numbers<[1], [0], [0], [1], [0, 0, 1, 1], [], []>} : vector<64x256xf32>, vector<256x64xf32>, vector<64x64xf32> -> vector<64x64xf32>
    %3 = vector.shape_cast %2 : vector<64x64xf32> to vector<2x4x8x64xf32>
    %4 = vector.extract_strided_slice %3 {offsets = [0, 0, 0, 0], sizes = [2, 1, 8, 64], strides = [1, 1, 1, 1]} : vector<2x4x8x64xf32> to vector<2x1x8x64xf32>
    %5 = vector.shape_cast %4 : vector<2x1x8x64xf32> to vector<2x8x64xf32>
    %6 = vector.extract_strided_slice %3 {offsets = [0, 1, 0, 0], sizes = [2, 1, 8, 64], strides = [1, 1, 1, 1]} : vector<2x4x8x64xf32> to vector<2x1x8x64xf32>
    %7 = vector.shape_cast %6 : vector<2x1x8x64xf32> to vector<2x8x64xf32>
    %8 = arith.maximumf %5, %7 : vector<2x8x64xf32>
    %9 = vector.extract_strided_slice %3 {offsets = [0, 2, 0, 0], sizes = [2, 1, 8, 64], strides = [1, 1, 1, 1]} : vector<2x4x8x64xf32> to vector<2x1x8x64xf32>
    %10 = vector.shape_cast %9 : vector<2x1x8x64xf32> to vector<2x8x64xf32>
    %11 = vector.extract_strided_slice %3 {offsets = [0, 3, 0, 0], sizes = [2, 1, 8, 64], strides = [1, 1, 1, 1]} : vector<2x4x8x64xf32> to vector<2x1x8x64xf32>
    %12 = vector.shape_cast %11 : vector<2x1x8x64xf32> to vector<2x8x64xf32>
    %13 = arith.maximumf %10, %12 : vector<2x8x64xf32>
    %14 = arith.maximumf %8, %13 : vector<2x8x64xf32>
    %15 = vector.shape_cast %14 : vector<2x8x64xf32> to vector<16x64xf32>
    %c0_3 = arith.constant 0 : index
    %c0_4 = arith.constant 0 : index
    %16 = vector.load %arg3[%c0_3, %c0_4] : memref<1x64xf32, #tpu.memory_space<vmem>>, vector<1x64xf32>
    %17 = vector.broadcast %16 : vector<1x64xf32> to vector<16x64xf32>
    %18 = arith.addf %15, %17 : vector<16x64xf32>
    %cst_5 = arith.constant 0.000000e+00 : f32
    %19 = vector.broadcast %cst_5 : f32 to vector<16x64xf32>
    %20 = arith.maximumf %18, %19 : vector<16x64xf32>
    %21 = vector.shape_cast %20 : vector<16x64xf32> to vector<2x8x64xf32>
    %c1_i32 = arith.constant 1 : i32
    %22 = tpu.dynamic_rotate %21 by %c1_i32 dim 1 : vector<2x8x64xf32>, i32 -> vector<2x8x64xf32>
    %23 = vector.shape_cast %22 : vector<2x8x64xf32> to vector<16x64xf32>
    %c7_i32 = arith.constant 7 : i32
    %24 = tpu.dynamic_rotate %21 by %c7_i32 dim 1 : vector<2x8x64xf32>, i32 -> vector<2x8x64xf32>
    %25 = vector.shape_cast %24 : vector<2x8x64xf32> to vector<16x64xf32>
    %26 = tpu.concatenate %23, %20, %25 in 1 : vector<16x64xf32>, vector<16x64xf32>, vector<16x64xf32> -> vector<16x192xf32>
    %c0_6 = arith.constant 0 : index
    %c0_7 = arith.constant 0 : index
    %27 = vector.load %arg4[%c0_6, %c0_7] : memref<192x128xf32, #tpu.memory_space<vmem>>, vector<192x128xf32>
    %cst_8 = arith.constant dense<0.000000e+00> : vector<16x128xf32>
    %28 = tpu.matmul %26, %27, %cst_8 {dimension_numbers = #tpu.dot_dimension_numbers<[1], [0], [0], [1], [0, 0, 1, 1], [], []>} : vector<16x192xf32>, vector<192x128xf32>, vector<16x128xf32> -> vector<16x128xf32>
    %c0_9 = arith.constant 0 : index
    %c0_10 = arith.constant 0 : index
    %29 = vector.load %arg5[%c0_9, %c0_10] : memref<1x128xf32, #tpu.memory_space<vmem>>, vector<1x128xf32>
    %30 = vector.broadcast %29 : vector<1x128xf32> to vector<16x128xf32>
    %31 = arith.addf %28, %30 : vector<16x128xf32>
    %cst_11 = arith.constant 0.000000e+00 : f32
    %32 = vector.broadcast %cst_11 : f32 to vector<16x128xf32>
    %33 = arith.maximumf %31, %32 : vector<16x128xf32>
    %34 = vector.shape_cast %33 : vector<16x128xf32> to vector<2x8x128xf32>
    %35 = vector.shape_cast %34 : vector<2x8x128xf32> to vector<2x1024xf32>
    %c0_12 = arith.constant 0 : index
    %c0_13 = arith.constant 0 : index
    %36 = vector.load %arg6[%c0_12, %c0_13] : memref<1024x128xf32, #tpu.memory_space<vmem>>, vector<1024x128xf32>
    %cst_14 = arith.constant dense<0.000000e+00> : vector<2x128xf32>
    %37 = tpu.matmul %35, %36, %cst_14 {dimension_numbers = #tpu.dot_dimension_numbers<[1], [0], [0], [1], [0, 0, 1, 1], [], []>} : vector<2x1024xf32>, vector<1024x128xf32>, vector<2x128xf32> -> vector<2x128xf32>
    %c0_15 = arith.constant 0 : index
    %c0_16 = arith.constant 0 : index
    %38 = vector.load %arg7[%c0_15, %c0_16] : memref<1x128xf32, #tpu.memory_space<vmem>>, vector<1x128xf32>
    %39 = vector.broadcast %38 : vector<1x128xf32> to vector<2x128xf32>
    %40 = arith.addf %37, %39 : vector<2x128xf32>
    %cst_17 = arith.constant 0.000000e+00 : f32
    %41 = vector.broadcast %cst_17 : f32 to vector<2x128xf32>
    %42 = arith.maximumf %40, %41 : vector<2x128xf32>
    %c0_18 = arith.constant 0 : index
    %c0_19 = arith.constant 0 : index
    %43 = vector.load %arg8[%c0_18, %c0_19] : memref<1x128xf32, #tpu.memory_space<vmem>>, vector<1x128xf32>
    %44 = vector.broadcast %43 : vector<1x128xf32> to vector<2x128xf32>
    %45 = arith.mulf %42, %44 : vector<2x128xf32>
    %cst_20 = arith.constant dense<0.000000e+00> : vector<2xf32>
    %46 = vector.multi_reduction <add>, %45, %cst_20 [1] : vector<2x128xf32> to vector<2xf32>
    %47 = vector.shape_cast %46 : vector<2xf32> to vector<2x1xf32>
    %c0_21 = arith.constant 0 : index
    %c0_22 = arith.constant 0 : index
    %48 = vector.load %arg9[%c0_21, %c0_22] : memref<1x1xf32, #tpu.memory_space<vmem>>, vector<1x1xf32>
    %49 = vector.broadcast %48 : vector<1x1xf32> to vector<2x1xf32>
    %50 = arith.addf %47, %49 : vector<2x1xf32>
    %51 = math.absf %50 : vector<2x1xf32>
    %cst_23 = arith.constant 0.000000e+00 : f32
    %52 = vector.broadcast %cst_23 : f32 to vector<2x1xf32>
    %53 = arith.subf %52, %51 : vector<2x1xf32>
    %54 = math.exp %53 : vector<2x1xf32>
    %cst_24 = arith.constant 0.000000e+00 : f32
    %55 = vector.broadcast %cst_24 : f32 to vector<2x1xf32>
    %56 = arith.cmpf oge, %50, %55 : vector<2x1xf32>
    %cst_25 = arith.constant 1.000000e+00 : f32
    %57 = vector.broadcast %cst_25 : f32 to vector<2x1xf32>
    %58 = arith.select %56, %57, %54 : vector<2x1xi1>, vector<2x1xf32>
    %cst_26 = arith.constant 1.000000e+00 : f32
    %59 = vector.broadcast %cst_26 : f32 to vector<2x1xf32>
    %60 = arith.addf %59, %54 : vector<2x1xf32>
    %61 = arith.divf %58, %60 : vector<2x1xf32>
    %c0_27 = arith.constant 0 : index
    %c0_28 = arith.constant 0 : index
    %62 = vector.load %arg10[%c0_27, %c0_28] : memref<2x1xf32, #tpu.memory_space<vmem>>, vector<2x1xf32>
    tpu.vector_store %arg10[%c0_27, %c0_28], %61 {strides = array<i32>} : memref<2x1xf32, #tpu.memory_space<vmem>>, vector<2x1xf32>,
    return
  }
  func.func @transform_0(%arg0: i32) -> (i32, i32) {
    %c0_i32 = arith.constant 0 : i32
    %c0_i32_0 = arith.constant 0 : i32
    return %arg0, %c0_i32 : i32, i32
  }
  func.func @transform_1(%arg0: i32) -> (i32, i32) {
    %c0_i32 = arith.constant 0 : i32
    %c0_i32_0 = arith.constant 0 : i32
    %c0_i32_1 = arith.constant 0 : i32
    return %c0_i32, %c0_i32_0 : i32, i32
  }
  func.func @transform_2(%arg0: i32) -> (i32, i32) {
    %c0_i32 = arith.constant 0 : i32
    %c0_i32_0 = arith.constant 0 : i32
    %c0_i32_1 = arith.constant 0 : i32
    return %c0_i32, %c0_i32_0 : i32, i32
  }
  func.func @transform_3(%arg0: i32) -> (i32, i32) {
    %c0_i32 = arith.constant 0 : i32
    %c0_i32_0 = arith.constant 0 : i32
    %c0_i32_1 = arith.constant 0 : i32
    return %c0_i32, %c0_i32_0 : i32, i32
  }
  func.func @transform_4(%arg0: i32) -> (i32, i32) {
    %c0_i32 = arith.constant 0 : i32
    %c0_i32_0 = arith.constant 0 : i32
    %c0_i32_1 = arith.constant 0 : i32
    return %c0_i32, %c0_i32_0 : i32, i32
  }
  func.func @transform_5(%arg0: i32) -> (i32, i32) {
    %c0_i32 = arith.constant 0 : i32
    %c0_i32_0 = arith.constant 0 : i32
    %c0_i32_1 = arith.constant 0 : i32
    return %c0_i32, %c0_i32_0 : i32, i32
  }
  func.func @transform_6(%arg0: i32) -> (i32, i32) {
    %c0_i32 = arith.constant 0 : i32
    %c0_i32_0 = arith.constant 0 : i32
    %c0_i32_1 = arith.constant 0 : i32
    return %c0_i32, %c0_i32_0 : i32, i32
  }
  func.func @transform_7(%arg0: i32) -> (i32, i32) {
    %c0_i32 = arith.constant 0 : i32
    %c0_i32_0 = arith.constant 0 : i32
    %c0_i32_1 = arith.constant 0 : i32
    return %c0_i32, %c0_i32_0 : i32, i32
  }
  func.func @transform_8(%arg0: i32) -> (i32, i32) {
    %c0_i32 = arith.constant 0 : i32
    %c0_i32_0 = arith.constant 0 : i32
    %c0_i32_1 = arith.constant 0 : i32
    return %c0_i32, %c0_i32_0 : i32, i32
  }
  func.func @transform_9(%arg0: i32) -> (i32, i32) {
    %c0_i32 = arith.constant 0 : i32
    %c0_i32_0 = arith.constant 0 : i32
    return %arg0, %c0_i32 : i32, i32
  }
}

</mosaic_0001>

<bundles_post_ra>
// kernel: aqpnet_forward.1
= control target key start
LH: loop header
LB: loop body
LE: loop exit
PB: predicated region body
PF: predicated region fallthrough
CT: control target
= control target key end

     0   :  { %vm216_vm0 = vcmask 523264   ;;  %s1251_s22 = smov 64   ;;  %vm817_vm1 = vcmask 1041408   ;;  %vm838_vm3 = vcmask 1024   ;;  %s1938_s1 = inlined_call_operand.vmem [shape: f32[256,64], index: 1, kind: input, shape index: {}]   ;;  %s1939_s0 = inlined_call_operand.vmem [shape: f32[64,256], index: 0, kind: input, shape index: {}]   ;;  %s1940_s3 = inlined_call_operand.vmem [shape: f32[192,128], index: 3, kind: input, shape index: {}]   ;;  %s1941_s2 = inlined_call_operand.vmem [shape: f32[1,64], index: 2, kind: input, shape index: {}]   ;;  %s1942_s5 = inlined_call_operand.vmem [shape: f32[1024,128], index: 5, kind: input, shape index: {}]   ;;  %s1943_s4 = inlined_call_operand.vmem [shape: f32[1,128], index: 4, kind: input, shape index: {}]   ;;  %s1944_s8 = inlined_call_operand.<no memory space> [shape: f32[1,1], index: 8, kind: input, shape index: {}]   ;;  %s1945_s6 = inlined_call_operand.vmem [shape: f32[1,128], index: 6, kind: input, shape index: {}]   ;;  %s1946_s7 = inlined_call_operand.vmem [shape: f32[1,128], index: 7, kind: input, shape index: {}]   ;;  %s1947_s9 = inlined_call_operand.vmem [shape: f32[2,1], index: 9, kind: output, shape index: {}]  }
   0x1   :  { %v66_v0 = vld [vmem:[%s1938_s1 + $0x80] sm:$0xff]  ;;  %v67_v1 = vld [vmem:[%s1938_s1 + $0x88] sm:$0xff]  ;;  %v68_v5 = vld [vmem:[%s1938_s1 + $0x90] sm:$0xff] }
   0x2   :  { %v50_v2 = vld [vmem:[%s1938_s1] sm:$0xff]  ;;  %v1047_v3 = vpack.c.bf16 %v67_v1, %v66_v0  ;;  %v51_v4 = vld [vmem:[%s1938_s1 + $0x8] sm:$0xff]  ;;  %v69_v6 = vld [vmem:[%s1938_s1 + $0x98] sm:$0xff]  ;;  %v1250_v0 = vmov 0.0|0.0  }
   0x3   :  { %v1049_v7 = vpack.c.bf16 %v51_v4, %v50_v2  ;;  %v1051_v8 = vpack.c.bf16 %v69_v6, %v68_v5  ;;  %v52_v9 = vld [vmem:[%s1938_s1 + $0x10] sm:$0xff]  ;;  %v53_v10 = vld [vmem:[%s1938_s1 + $0x18] sm:$0xff]  ;;  %v70_v11 = vld [vmem:[%s1938_s1 + $0xa0] sm:$0xff]  ;;  %1079 = vmatprep.subr.bf16.mxu1 %v1250_v0 }
   0x4   :  { %1048 = vmatprep.subr.bf16.mxu0 %v1047_v3  ;;  %v71_v12 = vld [vmem:[%s1938_s1 + $0xa8] sm:$0xff]  ;;  %v1053_v13 = vpack.c.bf16 %v53_v10, %v52_v9  ;;  %v54_v15 = vld [vmem:[%s1938_s1 + $0x20] sm:$0xff]  ;;  %v72_v17 = vld [vmem:[%s1938_s1 + $0xb0] sm:$0xff] }
   0x5   :  { %1050 = vmatpush3.bf16.msra.mxu0 %v1049_v7  ;;  %v1055_v14 = vpack.c.bf16 %v71_v12, %v70_v11  ;;  %v55_v16 = vld [vmem:[%s1938_s1 + $0x28] sm:$0xff]  ;;  %v73_v18 = vld [vmem:[%s1938_s1 + $0xb8] sm:$0xff]  ;;  %v56_v21 = vld [vmem:[%s1938_s1 + $0x30] sm:$0xff] }
   0x6   :  { %1052 = vmatprep.subr.bf16.mxu0 %v1051_v8  ;;  %v1057_v19 = vpack.c.bf16 %v55_v16, %v54_v15  ;;  %v1059_v20 = vpack.c.bf16 %v73_v18, %v72_v17  ;;  %v57_v22 = vld [vmem:[%s1938_s1 + $0x38] sm:$0xff]  ;;  %v74_v23 = vld [vmem:[%s1938_s1 + $0xc0] sm:$0xff]  ;;  %v75_v24 = vld [vmem:[%s1938_s1 + $0xc8] sm:$0xff] }
   0x7   :  { %v35_v25 = vld [vmem:[%s1939_s0 + $0x8] sm:$0xff]  ;;  %v1061_v26 = vpack.c.bf16 %v57_v22, %v56_v21  ;;  %v1063_v27 = vpack.c.bf16 %v75_v24, %v74_v23  ;;  %v58_v28 = vld [vmem:[%s1938_s1 + $0x40] sm:$0xff]  ;;  %v76_v30 = vld [vmem:[%s1938_s1 + $0xd0] sm:$0xff] }
   0x8   :  { %146 = vmatprep.mubr.f32.mxu0 %v35_v25  ;;  %v59_v29 = vld [vmem:[%s1938_s1 + $0x48] sm:$0xff]  ;;  %v77_v31 = vld [vmem:[%s1938_s1 + $0xd8] sm:$0xff]  ;;  %v60_v34 = vld [vmem:[%s1938_s1 + $0x50] sm:$0xff] }
   0x9   :  { %1054 = vmatpush3.bf16.msra.mxu0 %v1053_v13  ;;  %v1065_v32 = vpack.c.bf16 %v59_v29, %v58_v28  ;;  %v1067_v33 = vpack.c.bf16 %v77_v31, %v76_v30  ;;  %v61_v35 = vld [vmem:[%s1938_s1 + $0x58] sm:$0xff]  ;;  %v78_v36 = vld [vmem:[%s1938_s1 + $0xe0] sm:$0xff]  ;;  %v79_v37 = vld [vmem:[%s1938_s1 + $0xe8] sm:$0xff] }
   0xa   :  { %1056 = vmatprep.subr.bf16.mxu0 %v1055_v14  ;;  %v1069_v38 = vpack.c.bf16 %v61_v35, %v60_v34  ;;  %v1071_v39 = vpack.c.bf16 %v79_v37, %v78_v36  ;;  %v62_v40 = vld [vmem:[%s1938_s1 + $0x60] sm:$0xff]  ;;  %v63_v41 = vld [vmem:[%s1938_s1 + $0x68] sm:$0xff]  ;;  %v80_v42 = vld [vmem:[%s1938_s1 + $0xf0] sm:$0xff] }
   0xb   :  { %v81_v43 = vld [vmem:[%s1938_s1 + $0xf8] sm:$0xff]  ;;  %v1073_v44 = vpack.c.bf16 %v63_v41, %v62_v40  ;;  %v64_v46 = vld [vmem:[%s1938_s1 + $0x70] sm:$0xff]  ;;  %v34_v49 = vld [vmem:[%s1939_s0] sm:$0xff] }
   0xc   :  { %v1075_v45 = vpack.c.bf16 %v81_v43, %v80_v42  ;;  %v65_v47 = vld [vmem:[%s1938_s1 + $0x78] sm:$0xff]  ;;  %v36_v51 = vld [vmem:[%s1939_s0 + $0x10] sm:$0xff]  ;;  %v39_v52 = vld [vmem:[%s1939_s0 + $0x28] sm:$0xff] }
   0xd   :  { %1058 = vmatpush3.bf16.msra.mxu0 %v1057_v19  ;;  %v1077_v48 = vpack.c.bf16 %v65_v47, %v64_v46  ;;  %v37_v50 = vld [vmem:[%s1939_s0 + $0x18] sm:$0xff]  ;;  %v38_v53 = vld [vmem:[%s1939_s0 + $0x20] sm:$0xff]  ;;  %v40_v55 = vld [vmem:[%s1939_s0 + $0x30] sm:$0xff] }
   0xe   :  { %1060 = vmatprep.subr.bf16.mxu0 %v1059_v20  ;;  %v41_v54 = vld [vmem:[%s1939_s0 + $0x38] sm:$0xff]  ;;  %v43_v56 = vld [vmem:[%s1939_s0 + $0x48] sm:$0xff]  ;;  %v42_v57 = vld [vmem:[%s1939_s0 + $0x40] sm:$0xff] }
   0xf   :  { %v45_v58 = vld [vmem:[%s1939_s0 + $0x58] sm:$0xff]  ;;  %v44_v59 = vld [vmem:[%s1939_s0 + $0x50] sm:$0xff]  ;;  %v47_v60 = vld [vmem:[%s1939_s0 + $0x68] sm:$0xff] }
  0x10   :  { %v46_v61 = vld [vmem:[%s1939_s0 + $0x60] sm:$0xff]  ;;  %v49_v62 = vld [vmem:[%s1939_s0 + $0x78] sm:$0xff]  ;;  %v48_v63 = vld [vmem:[%s1939_s0 + $0x70] sm:$0xff] }
  0x11   :  { %1062 = vmatpush3.bf16.msra.mxu0 %v1061_v26  ;;  %v219_v1 = vld [vmem:[%s1940_s3] sm:$0xff]  ;;  %v220_v2 = vld [vmem:[%s1940_s3 + $0x8] sm:$0xff]  ;;  %v221_v3 = vld [vmem:[%s1940_s3 + $0x10] sm:$0xff] }
  0x12   :  { %1064 = vmatprep.subr.bf16.mxu0 %v1063_v27  ;;  %v1080_v4 = vpack.c.bf16 %v220_v2, %v219_v1  ;;  %v222_v5 = vld [vmem:[%s1940_s3 + $0x18] sm:$0xff]  ;;  %v223_v7 = vld [vmem:[%s1940_s3 + $0x20] sm:$0xff]  ;;  %v224_v8 = vld [vmem:[%s1940_s3 + $0x28] sm:$0xff] }
  0x13   :  { %v1083_v6 = vpack.c.bf16 %v222_v5, %v221_v3  ;;  %v1086_v9 = vpack.c.bf16 %v224_v8, %v223_v7  ;;  %v225_v10 = vld [vmem:[%s1940_s3 + $0x30] sm:$0xff]  ;;  %v226_v11 = vld [vmem:[%s1940_s3 + $0x38] sm:$0xff]  ;;  %v227_v13 = vld [vmem:[%s1940_s3 + $0x40] sm:$0xff] }
  0x14   :  { %1081 = vmatpush1.bf16.msra.mxu1 %v1080_v4  ;;  %v1089_v12 = vpack.c.bf16 %v226_v11, %v225_v10  ;;  %v228_v14 = vld [vmem:[%s1940_s3 + $0x48] sm:$0xff]  ;;  %v229_v16 = vld [vmem:[%s1940_s3 + $0x50] sm:$0xff]  ;;  %v230_v17 = vld [vmem:[%s1940_s3 + $0x58] sm:$0xff] }
  0x15   :  { %1066 = vmatpush3.bf16.msra.mxu0 %v1065_v32  ;;  %1082 = vmatprep.subr.bf16.mxu1 %v1250_v0  ;;  %v1092_v15 = vpack.c.bf16 %v228_v14, %v227_v13  ;;  %v1095_v18 = vpack.c.bf16 %v230_v17, %v229_v16  ;;  %v231_v19 = vld [vmem:[%s1940_s3 + $0x60] sm:$0xff]  ;;  %v232_v20 = vld [vmem:[%s1940_s3 + $0x68] sm:$0xff]  ;;  %v233_v22 = vld [vmem:[%s1940_s3 + $0x70] sm:$0xff] }
  0x16   :  { %1068 = vmatprep.subr.bf16.mxu0 %v1067_v33  ;;  %v1098_v21 = vpack.c.bf16 %v232_v20, %v231_v19  ;;  %v234_v23 = vld [vmem:[%s1940_s3 + $0x78] sm:$0xff]  ;;  %v235_v25 = vld [vmem:[%s1940_s3 + $0x80] sm:$0xff]  ;;  %v236_v26 = vld [vmem:[%s1940_s3 + $0x88] sm:$0xff] }
  0x17   :  { %v1101_v24 = vpack.c.bf16 %v234_v23, %v233_v22  ;;  %v1104_v27 = vpack.c.bf16 %v236_v26, %v235_v25  ;;  %v237_v28 = vld [vmem:[%s1940_s3 + $0x90] sm:$0xff]  ;;  %v238_v29 = vld [vmem:[%s1940_s3 + $0x98] sm:$0xff]  ;;  %v239_v31 = vld [vmem:[%s1940_s3 + $0xa0] sm:$0xff] }
  0x18   :  { %1084 = vmatpush1.bf16.msra.mxu1 %v1083_v6  ;;  %v1107_v30 = vpack.c.bf16 %v238_v29, %v237_v28  ;;  %v240_v32 = vld [vmem:[%s1940_s3 + $0xa8] sm:$0xff]  ;;  %v241_v34 = vld [vmem:[%s1940_s3 + $0xb0] sm:$0xff]  ;;  %v242_v35 = vld [vmem:[%s1940_s3 + $0xb8] sm:$0xff] }
  0x19   :  { %1070 = vmatpush3.bf16.msra.mxu0 %v1069_v38  ;;  %1085 = vmatprep.subr.bf16.mxu1 %v1250_v0  ;;  %v1110_v33 = vpack.c.bf16 %v240_v32, %v239_v31  ;;  %v1113_v36 = vpack.c.bf16 %v242_v35, %v241_v34  ;;  %v349_v4 = vld [vmem:[%s1942_s5 + $0x80] sm:$0xff]  ;;  %v350_v5 = vld [vmem:[%s1942_s5 + $0x88] sm:$0xff]  ;;  %v351_v28 = vld [vmem:[%s1942_s5 + $0x90] sm:$0xff] }
  0x1a   :  { %1072 = vmatprep.subr.bf16.mxu0 %v1071_v39  ;;  %v333_v6 = vld [vmem:[%s1942_s5] sm:$0xff]  ;;  %v1115_v8 = vpack.c.bf16 %v350_v5, %v349_v4  ;;  %v382_v11 = vld [vmem:[%s1942_s5 + $0x188] sm:$0xff]  ;;  %v352_v29 = vld [vmem:[%s1942_s5 + $0x98] sm:$0xff] }
  0x1b   :  { %v381_v10 = vld [vmem:[%s1942_s5 + $0x180] sm:$0xff]  ;;  %v366_v26 = vld [vmem:[%s1942_s5 + $0x108] sm:$0xff]  ;;  %v335_v31 = vld [vmem:[%s1942_s5 + $0x10] sm:$0xff] }
  0x1c   :  { %1087 = vmatpush1.bf16.msra.mxu1 %v1086_v9  ;;  %v334_v9 = vld [vmem:[%s1942_s5 + $0x8] sm:$0xff]  ;;  %v1147_v13 = vpack.c.bf16 %v382_v11, %v381_v10  ;;  %v365_v25 = vld [vmem:[%s1942_s5 + $0x100] sm:$0xff]  ;;  %v336_v32 = vld [vmem:[%s1942_s5 + $0x18] sm:$0xff] }
  0x1d   :  { %1074 = vmatpush3.bf16.msra.mxu0 %v1073_v44  ;;  %1088 = vmatprep.subr.bf16.mxu1 %v1250_v0  ;;  %v383_v34 = vld [vmem:[%s1942_s5 + $0x190] sm:$0xff]  ;;  %v384_v35 = vld [vmem:[%s1942_s5 + $0x198] sm:$0xff]  ;;  %v389_v5 = vld [vmem:[%s1942_s5 + $0x1c0] sm:$0xff] }
  0x1e   :  { %1076 = vmatprep.subr.bf16.mxu0 %v1075_v45  ;;  %v374_v10 = vld [vmem:[%s1942_s5 + $0x148] sm:$0xff] }
  0x20   :  { %1090 = vmatpush1.bf16.msra.mxu1 %v1089_v12  ;;  %v1117_v12 = vpack.c.bf16 %v334_v9, %v333_v6  ;;  %v390_v6 = vld [vmem:[%s1942_s5 + $0x1c8] sm:$0xff]  ;;  %v373_v9 = vld [vmem:[%s1942_s5 + $0x140] sm:$0xff] }
  0x21   :  { %1078 = vmatpush3.bf16.msra.mxu0 %v1077_v48  ;;  %1091 = vmatprep.subr.bf16.mxu1 %v1250_v0  ;;  %v1165_v11 = vpack.c.bf16 %v374_v10, %v373_v9  ;;  %v397_v9 = vld [vmem:[%s1942_s5 + $0x200] sm:$0xff]  ;;  %v398_v10 = vld [vmem:[%s1942_s5 + $0x208] sm:$0xff] }
  0x22   :  { %1116 = vmatprep.subr.bf16.mxu0 %v1115_v8  ;;  %v1163_v8 = vpack.c.bf16 %v390_v6, %v389_v5 }
  0x24   :  { %147 = vmatmul.mubr.f32.vlgmr.msra.gmra.mrb[0].mxu0 %v34_v49  ;;  %1093 = vmatpush1.bf16.msra.mxu1 %v1092_v15 }
  0x25   :  { %151 = vmatprep.mubr.f32.mxu0 %v37_v50  ;;  %1094 = vmatprep.subr.bf16.mxu1 %v1250_v0 }
  0x26   :  { %1118 = vmatpush3.bf16.msra.mxu0 %v1117_v12  ;;  %v359_v12 = vld [vmem:[%s1942_s5 + $0xd0] sm:$0xff] }
  0x28   :  { %152 = vmatmul.mubr.f32.gmra.mrb[2].mxu0 %v36_v51  ;;  %1096 = vmatpush1.bf16.msra.mxu1 %v1095_v18 }
  0x29   :  { %156 = vmatprep.mubr.f32.mxu0 %v39_v52  ;;  %1097 = vmatprep.subr.bf16.mxu1 %v1250_v0 }
  0x2c   :  { %157 = vmatmul.mubr.f32.gmra.mrb[4].mxu0 %v38_v53  ;;  %1099 = vmatpush1.bf16.msra.mxu1 %v1098_v21  ;;  %v844_v53 = vld [vmem:[%s1941_s2] ss:$0 sm:$0xff] }
  0x2d   :  { %161 = vmatprep.mubr.f32.mxu0 %v41_v54  ;;  %1100 = vmatprep.subr.bf16.mxu1 %v1250_v0 }
  0x30   :  { %162 = vmatmul.mubr.f32.gmra.mrb[6].mxu0 %v40_v55  ;;  %1102 = vmatpush1.bf16.msra.mxu1 %v1101_v24 }
  0x31   :  { %166 = vmatprep.mubr.f32.mxu0 %v43_v56  ;;  %1103 = vmatprep.subr.bf16.mxu1 %v1250_v0 }
  0x34   :  { %167 = vmatmul.mubr.f32.gmra.mrb[8].mxu0 %v42_v57  ;;  %1105 = vmatpush1.bf16.msra.mxu1 %v1104_v27  ;;  %v1149_v27 = vpack.c.bf16 %v366_v26, %v365_v25  ;;  %v362_v25 = vld [vmem:[%s1942_s5 + $0xe8] sm:$0xff] }
  0x35   :  { %171 = vmatprep.mubr.f32.mxu0 %v45_v58  ;;  %1106 = vmatprep.subr.bf16.mxu1 %v1250_v0 }
  0x38   :  { %172 = vmatmul.mubr.f32.gmra.mrb[10].mxu0 %v44_v59  ;;  %1108 = vmatpush1.bf16.msra.mxu1 %v1107_v30  ;;  %v1119_v30 = vpack.c.bf16 %v352_v29, %v351_v28  ;;  %v346_v28 = vld [vmem:[%s1942_s5 + $0x68] sm:$0xff] }
  0x39   :  { %176 = vmatprep.mubr.f32.mxu0 %v47_v60  ;;  %1109 = vmatprep.subr.bf16.mxu1 %v1250_v0 }
  0x3a   :  { %1120 = vmatprep.subr.bf16.mxu0 %v1119_v30  ;;  %v393_v30 = vld [vmem:[%s1942_s5 + $0x1e0] sm:$0xff] }
  0x3c   :  { %177 = vmatmul.mubr.f32.gmra.mrb[12].mxu0 %v46_v61  ;;  %1111 = vmatpush1.bf16.msra.mxu1 %v1110_v33  ;;  %v1121_v33 = vpack.c.bf16 %v336_v32, %v335_v31  ;;  %v394_v31 = vld [vmem:[%s1942_s5 + $0x1e8] sm:$0xff] }
  0x3d   :  { %181 = vmatprep.mubr.f32.mxu0 %v49_v62  ;;  %1112 = vmatprep.subr.bf16.mxu1 %v1250_v0  ;;  %v1171_v32 = vpack.c.bf16 %v394_v31, %v393_v30 }
  0x3e   :  { %1122 = vmatpush3.bf16.msra.mxu0 %v1121_v33  ;;  %v377_v33 = vld [vmem:[%s1942_s5 + $0x160] sm:$0xff] }
  0x40   :  { %182 = vmatmul.mubr.f32.gmra.mrb[14].mxu0 %v48_v63  ;;  %1114 = vmatpush1.bf16.msra.mxu1 %v1113_v36  ;;  %v1151_v36 = vpack.c.bf16 %v384_v35, %v383_v34  ;;  %v378_v34 = vld [vmem:[%s1942_s5 + $0x168] sm:$0xff] }
  0x41   :  { %1148 = vmatprep.subr.bf16.mxu1 %v1147_v13  ;;  %v360_v13 = vld [vmem:[%s1942_s5 + $0xd8] sm:$0xff]  ;;  %v1173_v35 = vpack.c.bf16 %v378_v34, %v377_v33 }
  0x42   :  { %v432_v33 = vld [vmem:[%s1942_s5 + $0x318] sm:$0xff] }
  0xf7   :  { %v883_v37 = vpop.f32.mrb[0].mxu0 }
  0xf8   :  { %v884_v38 = vpop.f32.mrb[1].mxu0 }
  0xf9   :  { %v885_v39 = vadd.f32 %v884_v38, %v883_v37  ;;  %v367_v37 = vld [vmem:[%s1942_s5 + $0x110] sm:$0xff]  ;;  %v368_v38 = vld [vmem:[%s1942_s5 + $0x118] sm:$0xff] }
  0xfb   :  { %v886_v40 = vpop.f32.mrb[2].mxu0 }
  0xfc   :  { %v887_v41 = vpop.f32.mrb[3].mxu0 }
  0xfd   :  { %v888_v42 = vadd.f32 %v887_v41, %v886_v40  ;;  %v353_v40 = vld [vmem:[%s1942_s5 + $0xa0] sm:$0xff]  ;;  %v354_v41 = vld [vmem:[%s1942_s5 + $0xa8] sm:$0xff] }
  0xff   :  { %v187_v43 = vmax.f32 %v885_v39, %v888_v42  ;;  %v889_v44 = vpop.f32.mrb[4].mxu0  ;;  %v1153_v39 = vpack.c.bf16 %v368_v38, %v367_v37  ;;  %v1123_v42 = vpack.c.bf16 %v354_v41, %v353_v40  ;;  %v364_v37 = vld [vmem:[%s1942_s5 + $0xf8] sm:$0xff] }
 0x100   :  { %v890_v45 = vpop.f32.mrb[5].mxu0  ;;  %v348_v40 = vld [vmem:[%s1942_s5 + $0x78] sm:$0xff] }
 0x101   :  { %v891_v46 = vadd.f32 %v890_v45, %v889_v44  ;;  %v338_v44 = vld [vmem:[%s1942_s5 + $0x28] sm:$0xff]  ;;  %v385_v45 = vld [vmem:[%s1942_s5 + $0x1a0] sm:$0xff]  ;;  %1124 = vmatprep.subr.bf16.mxu0 %v1123_v42  ;;  %v395_v42 = vld [vmem:[%s1942_s5 + $0x1f0] sm:$0xff] }
 0x103   :  { %v892_v47 = vpop.f32.mrb[6].mxu0 }
 0x104   :  { %v893_v48 = vpop.f32.mrb[7].mxu0 }
 0x105   :  { %v894_v49 = vadd.f32 %v893_v48, %v892_v47  ;;  %v386_v47 = vld [vmem:[%s1942_s5 + $0x1a8] sm:$0xff]  ;;  %v369_v48 = vld [vmem:[%s1942_s5 + $0x120] sm:$0xff] }
 0x107   :  { %v189_v50 = vmax.f32 %v891_v46, %v894_v49  ;;  %v895_v51 = vpop.f32.mrb[8].mxu0  ;;  %v370_v49 = vld [vmem:[%s1942_s5 + $0x128] sm:$0xff] }
 0x108   :  { %v896_v52 = vpop.f32.mrb[9].mxu0 }
 0x109   :  { %v191_v54 = vmax.f32 %v187_v43, %v189_v50  ;;  %v897_v55 = vadd.f32 %v896_v52, %v895_v51  ;;  %v337_v43 = vld [vmem:[%s1942_s5 + $0x20] sm:$0xff]  ;;  %v1155_v50 = vpack.c.bf16 %v386_v47, %v385_v45  ;;  %v1157_v51 = vpack.c.bf16 %v370_v49, %v369_v48  ;;  %v355_v52 = vld [vmem:[%s1942_s5 + $0xb0] sm:$0xff]  ;;  %v414_v49 = vld [vmem:[%s1942_s5 + $0x288] sm:$0xff] }
 0x10a   :  { %v1125_v46 = vpack.c.bf16 %v338_v44, %v337_v43  ;;  %v396_v43 = vld [vmem:[%s1942_s5 + $0x1f8] sm:$0xff]  ;;  %v379_v45 = vld [vmem:[%s1942_s5 + $0x170] sm:$0xff]  ;;  %v413_v48 = vld [vmem:[%s1942_s5 + $0x280] sm:$0xff] }
 0x10b   :  { %v898_v56 = vpop.f32.mrb[10].mxu0  ;;  %v200_v57 = vadd.f32 %v844_v53, %v191_v54  ;;  %v339_v54 = vld [vmem:[%s1942_s5 + $0x30] sm:$0xff]  ;;  %v1175_v44 = vpack.c.bf16 %v396_v43, %v395_v42  ;;  %v420_v43 = vld [vmem:[%s1942_s5 + $0x2b8] sm:$0xff] }
 0x10c   :  { %v899_v58 = vpop.f32.mrb[11].mxu0  ;;  %1126 = vmatpush3.bf16.msra.mxu0 %v1125_v46  ;;  %v380_v46 = vld [vmem:[%s1942_s5 + $0x178] sm:$0xff]  ;;  %v419_v42 = vld [vmem:[%s1942_s5 + $0x2b0] sm:$0xff] }
 0x10d   :  { %v900_v59 = vadd.f32 %v899_v58, %v898_v56  ;;  %v202_v60 = vmax.f32 %v200_v57, 0.0  ;;  %v340_v56 = vld [vmem:[%s1942_s5 + $0x38] sm:$0xff]  ;;  %v387_v57 = vld [vmem:[%s1942_s5 + $0x1b0] sm:$0xff]  ;;  %v1177_v47 = vpack.c.bf16 %v380_v46, %v379_v45  ;;  %v433_v45 = vld [vmem:[%s1942_s5 + $0x320] sm:$0xff] }
 0x10e   :  { %v388_v58 = vld [vmem:[%s1942_s5 + $0x1b8] sm:$0xff]  ;;  %v434_v46 = vld [vmem:[%s1942_s5 + $0x328] sm:$0xff] }
 0x10f   :  { %v188_v61 = vmax.f32 %v897_v55, %v900_v59  ;;  %v901_v62 = vpop.f32.mrb[12].mxu0  ;;  %210 = vrot.lane.b32.xlu0 %v202_v60, %s1251_s22  ;;  %v206_v63 = vrot.slane %v202_v60, 1  ;;  %v204_v18 = vrot.slane %v202_v60, 7  ;;  %v1129_v59 = vpack.c.bf16 %v340_v56, %v339_v54 }
 0x110   :  { %v902_v0 = vpop.f32.mrb[13].mxu0  ;;  %v1159_v60 = vpack.c.bf16 %v388_v58, %v387_v57  ;;  %v1252_v56 = vmov 1966171168   ;;  %v475_v58 = vlaneseq }
 0x111   :  { %v903_v1 = vadd.f32 %v902_v0, %v901_v62  ;;  %846 = vmatprep.mubr.msk.f32.mxu1 %vm216_vm0, %v206_v63  ;;  %v372_v62 = vld [vmem:[%s1942_s5 + $0x138] sm:$0xff]  ;;  %v357_v63 = vld [vmem:[%s1942_s5 + $0xc0] sm:$0xff]  ;;  %v473_v57 = vunpack.c.l.s4 %v1252_v56 }
 0x113   :  { %v904_v2 = vpop.f32.mrb[14].mxu0 }
 0x114   :  { %v905_v3 = vpop.f32.mrb[15].mxu0 }
 0x115   :  { %v906_v7 = vadd.f32 %v905_v3, %v904_v2  ;;  %v341_v2 = vld [vmem:[%s1942_s5 + $0x40] sm:$0xff]  ;;  %v342_v3 = vld [vmem:[%s1942_s5 + $0x48] sm:$0xff] }
 0x117   :  { %v190_v14 = vmax.f32 %v903_v1, %v906_v7  ;;  %v358_v1 = vld [vmem:[%s1942_s5 + $0xc8] sm:$0xff]  ;;  %v1133_v7 = vpack.c.bf16 %v342_v3, %v341_v2 }
 0x118   :  { %v1131_v4 = vpack.c.bf16 %v358_v1, %v357_v63 }
 0x119   :  { %v192_v15 = vmax.f32 %v188_v61, %v190_v14  ;;  %v371_v61 = vld [vmem:[%s1942_s5 + $0x130] sm:$0xff]  ;;  %v1135_v14 = vpack.c.bf16 %v360_v13, %v359_v12  ;;  %v429_v13 = vld [vmem:[%s1942_s5 + $0x300] sm:$0xff] }
 0x11a   :  { %v1161_v0 = vpack.c.bf16 %v372_v62, %v371_v61  ;;  %v474_v61 = vunpack.c.0.s8 %v473_v57  ;;  %v476_v62 = vshrl.u32 %v475_v58, 7  ;;  %v435_v57 = vld [vmem:[%s1942_s5 + $0x330] sm:$0xff]  ;;  %v436_v58 = vld [vmem:[%s1942_s5 + $0x338] sm:$0xff] }
 0x11b   :  { %v201_v16 = vadd.f32 %v844_v53, %v192_v15  ;;  %v356_v53 = vld [vmem:[%s1942_s5 + $0xb8] sm:$0xff]  ;;  %v343_v15 = vld [vmem:[%s1942_s5 + $0x50] sm:$0xff] }
 0x11c   :  { %v1127_v55 = vpack.c.bf16 %v356_v53, %v355_v52  ;;  %v446_v52 = vld [vmem:[%s1942_s5 + $0x388] sm:$0xff] }
 0x11d   :  { %v203_v17 = vmax.f32 %v201_v16, 0.0  ;;  %v344_v16 = vld [vmem:[%s1942_s5 + $0x58] sm:$0xff] }
 0x11e   :  { %1128 = vmatprep.subr.bf16.mxu0 %v1127_v55 }
 0x11f   :  { %212 = vrot.lane.b32.xlu0 %v203_v17, %s1251_s22  ;;  %v207_v21 = vrot.slane %v203_v17, 1  ;;  %v205_v22 = vrot.slane %v203_v17, 7  ;;  %1130 = vmatpush3.bf16.msra.mxu0 %v1129_v59  ;;  %v1137_v17 = vpack.c.bf16 %v344_v16, %v343_v15  ;;  %v845_v59 = vld [vmem:[%s1943_s4] ss:$0 sm:$0xff]  ;;  %v430_v15 = vld [vmem:[%s1942_s5 + $0x308] sm:$0xff]  ;;  %v415_v16 = vld [vmem:[%s1942_s5 + $0x290] sm:$0xff] }
 0x120   :  { %1132 = vmatprep.subr.bf16.mxu0 %v1131_v4  ;;  %v1733_v4 = vsub.s32 %v474_v61, %v476_v62  ;;  %v454_v61 = vld [vmem:[%s1942_s5 + $0x3c8] sm:$0xff] }
 0x123   :  { %1134 = vmatpush3.bf16.msra.mxu0 %v1133_v7 }
 0x124   :  { %1136 = vmatprep.subr.bf16.mxu0 %v1135_v14 }
 0x127   :  { %1138 = vmatpush3.bf16.msra.mxu0 %v1137_v17  ;;  %v416_v17 = vld [vmem:[%s1942_s5 + $0x298] sm:$0xff] }
 0x181   :  { %v211_v19 = vpop.permute.xlu0 %210 }
 0x182   :  { %v217_v20 = vsel %vm216_vm0, %v204_v18, %v211_v19  ;;  %v391_v18 = vld [vmem:[%s1942_s5 + $0x1d0] sm:$0xff]  ;;  %v392_v19 = vld [vmem:[%s1942_s5 + $0x1d8] sm:$0xff] }
 0x183   :  { %321 = vmatmul.mubr.f32.vlgmr.msra.gmra.mrb[0].mxu1 %v217_v20  ;;  %v1167_v20 = vpack.c.bf16 %v392_v19, %v391_v18  ;;  %v1181_v19 = vpack.c.bf16 %v398_v10, %v397_v9  ;;  %v455_v10 = vld [vmem:[%s1942_s5 + $0x3d0] sm:$0xff] }
 0x184   :  { %847 = vmatprep.mubr.msk.f32.mxu1 %vm216_vm0, %v207_v21  ;;  %1150 = vmatpush3.bf16.msra.mxu1 %v1149_v27  ;;  %v375_v21 = vld [vmem:[%s1942_s5 + $0x150] sm:$0xff]  ;;  %v345_v27 = vld [vmem:[%s1942_s5 + $0x60] sm:$0xff] }
 0x185   :  { %1152 = vmatprep.subr.bf16.mxu1 %v1151_v36  ;;  %v1141_v29 = vpack.c.bf16 %v346_v28, %v345_v27  ;;  %v363_v36 = vld [vmem:[%s1942_s5 + $0xf0] sm:$0xff]  ;;  %v1183_v27 = vpack.c.bf16 %v416_v17, %v415_v16  ;;  %v417_v28 = vld [vmem:[%s1942_s5 + $0x2a0] sm:$0xff]  ;;  %v426_v17 = vld [vmem:[%s1942_s5 + $0x2e8] sm:$0xff] }
 0x186   :  { %v1143_v38 = vpack.c.bf16 %v364_v37, %v363_v36  ;;  %v450_v36 = vld [vmem:[%s1942_s5 + $0x3a8] sm:$0xff]  ;;  %v425_v16 = vld [vmem:[%s1942_s5 + $0x2e0] sm:$0xff] }
 0x188   :  { %1154 = vmatpush3.bf16.msra.mxu1 %v1153_v39  ;;  %v347_v39 = vld [vmem:[%s1942_s5 + $0x70] sm:$0xff] }
 0x189   :  { %1156 = vmatprep.subr.bf16.mxu1 %v1155_v50  ;;  %v1145_v41 = vpack.c.bf16 %v348_v40, %v347_v39  ;;  %v1179_v50 = vpack.c.bf16 %v414_v49, %v413_v48  ;;  %v401_v39 = vld [vmem:[%s1942_s5 + $0x220] sm:$0xff]  ;;  %v402_v40 = vld [vmem:[%s1942_s5 + $0x228] sm:$0xff]  ;;  %v451_v48 = vld [vmem:[%s1942_s5 + $0x3b0] sm:$0xff] }
 0x18a   :  { %v452_v49 = vld [vmem:[%s1942_s5 + $0x3b8] sm:$0xff] }
 0x18b   :  { %v1223_v56 = vpack.c.bf16 %v452_v49, %v451_v48  ;;  %v848_v49 = vld [vmem:[%s1945_s6] ss:$0 sm:$0xff] }
 0x18c   :  { %1158 = vmatpush3.bf16.msra.mxu1 %v1157_v51  ;;  %v445_v51 = vld [vmem:[%s1942_s5 + $0x380] sm:$0xff] }
 0x18d   :  { %1160 = vmatprep.subr.bf16.mxu1 %v1159_v60  ;;  %v1211_v53 = vpack.c.bf16 %v446_v52, %v445_v51  ;;  %v403_v51 = vld [vmem:[%s1942_s5 + $0x230] sm:$0xff]  ;;  %v404_v52 = vld [vmem:[%s1942_s5 + $0x238] sm:$0xff] }
 0x190   :  { %1162 = vmatpush3.bf16.msra.mxu1 %v1161_v0 }
 0x191   :  { %v213_v23 = vpop.permute.xlu0 %212  ;;  %1164 = vmatprep.subr.bf16.mxu1 %v1163_v8 }
 0x192   :  { %v218_v24 = vsel %vm216_vm0, %v205_v22, %v213_v23  ;;  %v376_v22 = vld [vmem:[%s1942_s5 + $0x158] sm:$0xff] }
 0x193   :  { %326 = vmatmul.mubr.f32.gmra.mrb[2].mxu1 %v218_v24  ;;  %v1169_v23 = vpack.c.bf16 %v376_v22, %v375_v21  ;;  %v361_v24 = vld [vmem:[%s1942_s5 + $0xe0] sm:$0xff]  ;;  %v448_v21 = vld [vmem:[%s1942_s5 + $0x398] sm:$0xff] }
 0x194   :  { %1166 = vmatpush3.bf16.msra.mxu1 %v1165_v11  ;;  %v1139_v26 = vpack.c.bf16 %v362_v25, %v361_v24  ;;  %v400_v24 = vld [vmem:[%s1942_s5 + $0x218] sm:$0xff] }
 0x195   :  { %1168 = vmatprep.subr.bf16.mxu1 %v1167_v20  ;;  %v447_v20 = vld [vmem:[%s1942_s5 + $0x390] sm:$0xff] }
 0x196   :  { %1140 = vmatprep.subr.bf16.mxu0 %v1139_v26  ;;  %v1213_v26 = vpack.c.bf16 %v430_v15, %v429_v13  ;;  %v1215_v31 = vpack.c.bf16 %v448_v21, %v447_v20  ;;  %v407_v13 = vld [vmem:[%s1942_s5 + $0x250] sm:$0xff]  ;;  %v440_v20 = vld [vmem:[%s1942_s5 + $0x358] sm:$0xff] }
 0x197   :  { %1142 = vmatpush3.bf16.msra.mxu0 %v1141_v29  ;;  %v418_v29 = vld [vmem:[%s1942_s5 + $0x2a8] sm:$0xff] }
 0x198   :  { %1170 = vmatpush3.bf16.msra.mxu1 %v1169_v23  ;;  %1144 = vmatprep.subr.bf16.mxu0 %v1143_v38  ;;  %v399_v23 = vld [vmem:[%s1942_s5 + $0x210] sm:$0xff]  ;;  %v1187_v38 = vpack.c.bf16 %v418_v29, %v417_v28  ;;  %v428_v29 = vld [vmem:[%s1942_s5 + $0x2f8] sm:$0xff] }
 0x199   :  { %1172 = vmatprep.subr.bf16.mxu1 %v1171_v32  ;;  %v431_v32 = vld [vmem:[%s1942_s5 + $0x310] sm:$0xff]  ;;  %v1185_v34 = vpack.c.bf16 %v400_v24, %v399_v23  ;;  %v458_v23 = vld [vmem:[%s1942_s5 + $0x3e8] sm:$0xff]  ;;  %v1203_v24 = vpack.c.bf16 %v426_v17, %v425_v16 }
 0x19a   :  { %v427_v28 = vld [vmem:[%s1942_s5 + $0x2f0] sm:$0xff] }
 0x19b   :  { %1146 = vmatpush3.bf16.msra.mxu0 %v1145_v41  ;;  %v1217_v41 = vpack.c.bf16 %v432_v33, %v431_v32  ;;  %v442_v32 = vld [vmem:[%s1942_s5 + $0x368] sm:$0xff] }
 0x19c   :  { %1174 = vmatpush3.bf16.msra.mxu1 %v1173_v35  ;;  %1180 = vmatprep.subr.bf16.mxu0 %v1179_v50  ;;  %v449_v35 = vld [vmem:[%s1942_s5 + $0x3a0] sm:$0xff]  ;;  %v1191_v50 = vpack.c.bf16 %v420_v43, %v419_v42  ;;  %v444_v42 = vld [vmem:[%s1942_s5 + $0x378] sm:$0xff] }
 0x19d   :  { %1176 = vmatprep.subr.bf16.mxu1 %v1175_v44  ;;  %v1219_v44 = vpack.c.bf16 %v450_v36, %v449_v35  ;;  %v460_v35 = vld [vmem:[%s1942_s5 + $0x3f8] sm:$0xff]  ;;  %v1207_v36 = vpack.c.bf16 %v428_v29, %v427_v28 }
 0x1a0   :  { %1178 = vmatpush3.bf16.msra.mxu1 %v1177_v47  ;;  %v1189_v47 = vpack.c.bf16 %v402_v40, %v401_v39 }
 0x1a1   :  { %1212 = vmatprep.subr.bf16.mxu1 %v1211_v53  ;;  %v1221_v53 = vpack.c.bf16 %v434_v46, %v433_v45 }
 0x256   :  { %v322_v54 = vpop.f32.mrb[0].mxu1 }
 0x257   :  { %v324_v55 = vpop.f32.mrb[1].mxu1  ;;  %v323_v60 = vadd.f32 %v845_v59, %v322_v54  ;;  %v421_v54 = vld [vmem:[%s1942_s5 + $0x2c0] sm:$0xff] }
 0x258   :  { %v422_v55 = vld [vmem:[%s1942_s5 + $0x2c8] sm:$0xff] }
 0x259   :  { %v331_v2 = vmax.f32 %v323_v60, 0.0  ;;  %v453_v60 = vld [vmem:[%s1942_s5 + $0x3c0] sm:$0xff]  ;;  %v1195_v62 = vpack.c.bf16 %v422_v55, %v421_v54 }
 0x266   :  { %v327_v63 = vpop.f32.mrb[2].mxu1 }
 0x267   :  { %v328_v0 = vadd.f32 %v845_v59, %v327_v63  ;;  %v329_v1 = vpop.f32.mrb[3].mxu1  ;;  %v1193_v59 = vpack.c.bf16 %v404_v52, %v403_v51  ;;  %v405_v63 = vld [vmem:[%s1942_s5 + $0x240] sm:$0xff] }
 0x268   :  { %v1225_v1 = vpack.c.bf16 %v436_v58, %v435_v57 }
 0x269   :  { %v332_v3 = vmax.f32 %v328_v0, 0.0  ;;  %v406_v0 = vld [vmem:[%s1942_s5 + $0x248] sm:$0xff] }
 0x26a   :  { %v1197_v9 = vpack.c.bf16 %v406_v0, %v405_v63  ;;  %v849_v63 = vld [vmem:[%s1946_s7] ss:$0 sm:$0xff] }
 0x26b   :  { %v470_v5 = vcombine.low %v331_v2, %v332_v3  ;;  %v471_v6 = vcombine.high %v331_v2, %v332_v3  ;;  %v423_v2 = vld [vmem:[%s1942_s5 + $0x2d0] sm:$0xff]  ;;  %v424_v3 = vld [vmem:[%s1942_s5 + $0x2d8] sm:$0xff] }
 0x26d   :  { %v478_v7 = vrot.slane %v470_v5, %v1733_v4  ;;  %v1737_v8 = vrot.slane %v471_v6, %v1733_v4  ;;  %v1227_v5 = vpack.c.bf16 %v454_v61, %v453_v60  ;;  %v437_v6 = vld [vmem:[%s1942_s5 + $0x340] sm:$0xff] }
 0x26f   :  { %v486_v11 = vcombine.high %v478_v7, %v478_v7  ;;  %v487_v12 = vcombine.high %v1737_v8, %v1737_v8  ;;  %v494_v14 = vrot.slane %v478_v7, %v1733_v4  ;;  %v438_v7 = vld [vmem:[%s1942_s5 + $0x348] sm:$0xff]  ;;  %v501_v45 = vrot.slane %v1737_v8, %v1733_v4 }
 0x270   :  { %v1229_v15 = vpack.c.bf16 %v438_v7, %v437_v6 }
 0x271   :  { %v508_v18 = vrot.slane %v486_v11, %v1733_v4  ;;  %v515_v22 = vrot.slane %v487_v12, %v1733_v4  ;;  %v516_v30 = vcombine.high %v494_v14, %v494_v14  ;;  %v456_v11 = vld [vmem:[%s1942_s5 + $0x3d8] sm:$0xff]  ;;  %v1199_v12 = vpack.c.bf16 %v424_v3, %v423_v2 }
 0x272   :  { %v517_v46 = vcombine.high %v501_v45, %v501_v45 }
 0x273   :  { %592 = vmatprep.mubr.f32.mxu0 %v508_v18  ;;  %v518_v25 = vcombine.high %v508_v18, %v508_v18  ;;  %v519_v37 = vcombine.high %v515_v22, %v515_v22  ;;  %v1231_v18 = vpack.c.bf16 %v456_v11, %v455_v10 }
 0x274   :  { %593 = vmatmul.mubr.f32.vlgmr.msra.gmra.mrb[16].mxu0 %v494_v14  ;;  %v408_v14 = vld [vmem:[%s1942_s5 + $0x258] sm:$0xff] }
 0x275   :  { %1182 = vmatpush3.bf16.msra.mxu0 %v1181_v19  ;;  %662 = vmatprep.mubr.f32.mxu1 %v518_v25  ;;  %v439_v19 = vld [vmem:[%s1942_s5 + $0x350] sm:$0xff]  ;;  %v1201_v21 = vpack.c.bf16 %v408_v14, %v407_v13  ;;  %v409_v25 = vld [vmem:[%s1942_s5 + $0x260] sm:$0xff] }
 0x276   :  { %732 = vmatprep.mubr.f32.mxu0 %v515_v22  ;;  %663 = vmatmul.mubr.f32.vlgmr.msra.gmra.mrb[4].mxu1 %v516_v30  ;;  %v457_v22 = vld [vmem:[%s1942_s5 + $0x3e0] sm:$0xff] }
 0x277   :  { %1214 = vmatpush3.bf16.msra.mxu1 %v1213_v26  ;;  %1184 = vmatprep.subr.bf16.mxu0 %v1183_v27  ;;  %v410_v26 = vld [vmem:[%s1942_s5 + $0x268] sm:$0xff]  ;;  %v1233_v27 = vpack.c.bf16 %v440_v20, %v439_v19  ;;  %v1235_v30 = vpack.c.bf16 %v458_v23, %v457_v22 }
 0x278   :  { %802 = vmatprep.mubr.f32.mxu1 %v519_v37  ;;  %1216 = vmatprep.subr.bf16.mxu1 %v1215_v31  ;;  %v441_v31 = vld [vmem:[%s1942_s5 + $0x360] sm:$0xff]  ;;  %v1205_v33 = vpack.c.bf16 %v410_v26, %v409_v25  ;;  %v411_v37 = vld [vmem:[%s1942_s5 + $0x270] sm:$0xff] }
 0x279   :  { %1186 = vmatpush3.bf16.msra.mxu0 %v1185_v34  ;;  %v459_v34 = vld [vmem:[%s1942_s5 + $0x3f0] sm:$0xff]  ;;  %v1237_v39 = vpack.c.bf16 %v442_v32, %v441_v31 }
 0x27a   :  { %1188 = vmatprep.subr.bf16.mxu0 %v1187_v38  ;;  %v412_v38 = vld [vmem:[%s1942_s5 + $0x278] sm:$0xff]  ;;  %v1239_v40 = vpack.c.bf16 %v460_v35, %v459_v34 }
 0x27b   :  { %1218 = vmatpush3.bf16.msra.mxu1 %v1217_v41  ;;  %v443_v41 = vld [vmem:[%s1942_s5 + $0x370] sm:$0xff]  ;;  %v1209_v43 = vpack.c.bf16 %v412_v38, %v411_v37 }
 0x27c   :  { %1220 = vmatprep.subr.bf16.mxu1 %v1219_v44  ;;  %v1241_v44 = vpack.c.bf16 %v444_v42, %v443_v41 }
 0x27d   :  { %1190 = vmatpush3.bf16.msra.mxu0 %v1189_v47  ;;  %v14_v47 = vstv %s1944_s8 }
 0x27e   :  { %1192 = vmatprep.subr.bf16.mxu0 %v1191_v50  ;;  %15 = vst [vmem:[#allocation2] sm:$0x1] %v14_v47 }
 0x27f   :  { %1222 = vmatpush3.bf16.msra.mxu1 %v1221_v53 }
 0x280   :  { %1224 = vmatprep.subr.bf16.mxu1 %v1223_v56 }
 0x281   :  { %1194 = vmatpush3.bf16.msra.mxu0 %v1193_v59 }
 0x282   :  { %1196 = vmatprep.subr.bf16.mxu0 %v1195_v62 }
 0x283   :  { %1226 = vmatpush3.bf16.msra.mxu1 %v1225_v1 }
 0x284   :  { %1228 = vmatprep.subr.bf16.mxu1 %v1227_v5 }
 0x285   :  { %1198 = vmatpush3.bf16.msra.mxu0 %v1197_v9  ;;  %v850_v3 = vld [vmem:[#allocation2] ss:$0 sm:$0xff] }
 0x286   :  { %1200 = vmatprep.subr.bf16.mxu0 %v1199_v12 }
 0x287   :  { %1230 = vmatpush3.bf16.msra.mxu1 %v1229_v15 }
 0x288   :  { %1232 = vmatprep.subr.bf16.mxu1 %v1231_v18 }
 0x289   :  { %1202 = vmatpush3.bf16.msra.mxu0 %v1201_v21 }
 0x28a   :  { %1204 = vmatprep.subr.bf16.mxu0 %v1203_v24 }
 0x28b   :  { %1234 = vmatpush3.bf16.msra.mxu1 %v1233_v27 }
 0x28c   :  { %1236 = vmatprep.subr.bf16.mxu1 %v1235_v30 }
 0x28d   :  { %1206 = vmatpush3.bf16.msra.mxu0 %v1205_v33 }
 0x28e   :  { %1208 = vmatprep.subr.bf16.mxu0 %v1207_v36 }
 0x28f   :  { %1238 = vmatpush3.bf16.msra.mxu1 %v1237_v39 }
 0x290   :  { %1240 = vmatprep.subr.bf16.mxu1 %v1239_v40 }
 0x291   :  { %1210 = vmatpush3.bf16.msra.mxu0 %v1209_v43 }
 0x293   :  { %1242 = vmatpush3.bf16.msra.mxu1 %v1241_v44 }
 0x294   :  { %733 = vmatmul.mubr.f32.vlgmr.msra.gmra.mrb[18].mxu0 %v501_v45 }
 0x296   :  { %803 = vmatmul.mubr.f32.vlgmr.msra.gmra.mrb[6].mxu1 %v517_v46 }
 0x347   :  { %v939_v48 = vpop.f32.mrb[16].mxu0 }
 0x348   :  { %v940_v50 = vpop.f32.mrb[17].mxu0 }
 0x349   :  { %v941_v51 = vadd.f32 %v940_v50, %v939_v48  ;;  %v974_v52 = vpop.f32.mrb[4].mxu1 }
 0x34a   :  { %v975_v4 = vpop.f32.mrb[5].mxu1 }
 0x34b   :  { %v595_v8 = vadd.f32 %v941_v51, %v848_v49  ;;  %v976_v53 = vadd.f32 %v975_v4, %v974_v52 }
 0x34d   :  { %v665_v54 = vadd.f32 %v976_v53, %v595_v8 }
 0x367   :  { %v1009_v55 = vpop.f32.mrb[18].mxu0 }
 0x368   :  { %v1010_v56 = vpop.f32.mrb[19].mxu0 }
 0x369   :  { %v1011_v57 = vadd.f32 %v1010_v56, %v1009_v55  ;;  %v1044_v58 = vpop.f32.mrb[6].mxu1 }
 0x36a   :  { %v1045_v59 = vpop.f32.mrb[7].mxu1 }
 0x36b   :  { %v735_v60 = vadd.f32 %v1011_v57, %v665_v54  ;;  %v1046_v61 = vadd.f32 %v1045_v59, %v1044_v58 }
 0x36d   :  { %v805_v62 = vadd.f32 %v1046_v61, %v735_v60 }
 0x36f   :  { %v808_v0 = vmax.f32 %v805_v62, 0.0 }
 0x371   :  { %v816_v1 = vmul.f32 %v849_v63, %v808_v0 }
 0x373   :  { %v818_v2 = vsel %vm817_vm1, %v816_v1, 0.0 }
 0x374   :  { %819 = vadd.xlane.f32.xlu1 %v818_v2 }
 0x401   :  { %v820_v5 = vpop.xlane.xlu1 %819 }
 0x402   :  { %v828_v6 = vadd.f32 %v850_v3, %v820_v5 }
 0x404   :  { %v829_v7 = vand.u32 2147483647, %v828_v6  ;;  %vm833_vm2 = vcmp.ge.f32.partialorder %v828_v6, 0.0 }
 0x406   :  { %v830_v9 = vsub.f32 0.0, %v829_v7 }
 0x408   :  { %v831_v10 = vmul.f32 1.442695, %v830_v9 }
 0x40a   :  { %1246 = vpow2.f32 %v831_v10 }
 0x414   :  { %v1247_v11 = vpop.eup %1246 }
 0x415   :  { %v835_v12 = vadd.f32 1.0, %v1247_v11  ;;  %v834_v14 = vsel %vm833_vm2, 1.0, %v1247_v11 }
 0x417   :  { %1248 = vrcp.f32 %v835_v12 }
 0x421   :  { %v1249_v13 = vpop.eup %1248 }
 0x422   :  { %v837_v15 = vmul.f32 %v1249_v13, %v834_v14 }
 0x424   :  { %839 = vst.msk [vmem:[%s1947_s9] sm:$0x3] %vm838_vm3, %v837_v15 }

</bundles_post_ra>
